<compile_context>
chip_gen: v5e
topology: v5e:2x2
jax: 0.10.0
libtpu: 0.0.40
codegen_flags: <defaults>
</compile_context>

<pallas_src>
import functools

import jax
import jax.numpy as jnp
from jax.experimental import pallas as pl
from jax.experimental.pallas import tpu as pltpu


def _round_up(x, m):
    return ((x + m - 1) // m) * m


def _generator_kernel(x_ref, w1_ref, b1_ref, w2_ref, b2_ref, o_ref, *, atype):
    # First linear (MXU, bf16 operands, f32 accumulation) + bias + ReLU (VPU, f32).
    h = jnp.dot(x_ref[...], w1_ref[...], preferred_element_type=jnp.float32)
    h = jnp.maximum(h + b1_ref[...], 0.0)

    # Second linear ("generate"): cast activations back to bf16 for the MXU.
    y = jnp.dot(h.astype(w2_ref.dtype), w2_ref[...],
                preferred_element_type=jnp.float32)
    y = y + b2_ref[...]

    if atype == "relu":
        y = jnp.maximum(y, 0.0)          # F.relu
    else:                                # "sigmoid" (validated in wrapper)
        y = jax.nn.sigmoid(y)            # torch.sigmoid (EUP exp + reciprocal)

    o_ref[...] = y.astype(o_ref.dtype)


def generator_forward(x, w1, b1, w2, b2, *, atype):
    """Fused Generator forward pass as a single Pallas TPU kernel.

    x  : (batch, z_dim)            f32 noise
    w1 : (z_dim, hidden_dim)       linear.weight.T
    b1 : (1, hidden_dim)
    w2 : (hidden_dim, image_size)  generate.weight.T
    b2 : (1, image_size)
    returns (batch, image_size) f32
    """
    if atype not in ("relu", "sigmoid"):
        raise ValueError(f"unsupported atype: {atype}")

    batch, z_dim = x.shape
    hidden_dim = w1.shape[1]
    image_size = w2.shape[1]

    # Lane-dense / sublane-friendly padded sizes.
    zp = _round_up(z_dim, 128)
    hp = _round_up(hidden_dim, 128)
    op = _round_up(image_size, 128)

    # Batch tile: 256 fills the v6e/v7x MXU; tiny batches run a single tile.
    tm = 256 if batch >= 256 else _round_up(batch, 8)
    bp = _round_up(batch, tm)

    f32 = jnp.float32
    bf16 = jnp.bfloat16

    # Zero-pad (padding is inert through both matmuls + relu) and cast the
    # matmul operands to bf16 to halve DMA bytes and hit the native MXU path.
    xp = jnp.zeros((bp, zp), bf16).at[:batch, :z_dim].set(x.astype(bf16))
    w1p = jnp.zeros((zp, hp), bf16).at[:z_dim, :hidden_dim].set(w1.astype(bf16))
    b1p = jnp.zeros((1, hp), f32).at[:, :hidden_dim].set(b1.astype(f32))
    w2p = jnp.zeros((hp, op), bf16).at[:hidden_dim, :image_size].set(w2.astype(bf16))
    b2p = jnp.zeros((1, op), f32).at[:, :image_size].set(b2.astype(f32))

    kernel = functools.partial(_generator_kernel, atype=atype)

    out_padded = pl.pallas_call(
        kernel,
        out_shape=jax.ShapeDtypeStruct((bp, op), f32),
        grid=(bp // tm,),
        in_specs=[
            pl.BlockSpec((tm, zp), lambda i: (i, 0)),   # x tile (per grid step)
            pl.BlockSpec((zp, hp), lambda i: (0, 0)),   # w1 (resident)
            pl.BlockSpec((1, hp), lambda i: (0, 0)),    # b1 (resident)
            pl.BlockSpec((hp, op), lambda i: (0, 0)),   # w2 (resident)
            pl.BlockSpec((1, op), lambda i: (0, 0)),    # b2 (resident)
        ],
        out_specs=pl.BlockSpec((tm, op), lambda i: (i, 0)),
        compiler_params=pltpu.CompilerParams(
            dimension_semantics=("parallel",),          # shards over v7x's 2 TCs
        ),
    )(xp, w1p, b1p, w2p, b2p)

    return out_padded[:batch, :image_size]


def init_generator_params(key, z_dim, hidden_dim, image_size):
    """Deterministic parameter init matching nn.Linear shapes.

    PyTorch nn.Linear stores weight as (out, in); we store the transpose
    (in, out) so the kernel can do x @ W directly.
    """
    k1, k2, k3, k4 = jax.random.split(key, 4)
    lim1 = 1.0 / jnp.sqrt(z_dim)
    lim2 = 1.0 / jnp.sqrt(hidden_dim)
    w1 = jax.random.uniform(k1, (z_dim, hidden_dim), jnp.float32, -lim1, lim1)
    b1 = jax.random.uniform(k2, (1, hidden_dim), jnp.float32, -lim1, lim1)
    w2 = jax.random.uniform(k3, (hidden_dim, image_size), jnp.float32, -lim2, lim2)
    b2 = jax.random.uniform(k4, (1, image_size), jnp.float32, -lim2, lim2)
    return w1, b1, w2, b2


if __name__ == "__main__":
    # Small shapes consistent with Generator(image_size, hidden_dim, z_dim, atype).
    batch = 2
    z_dim = 8
    hidden_dim = 32
    image_size = 64
    atype = "sigmoid"

    key = jax.random.PRNGKey(0)
    kx, kp = jax.random.split(key)
    x = jax.random.normal(kx, (batch, z_dim), dtype=jnp.float32)
    w1, b1, w2, b2 = init_generator_params(kp, z_dim, hidden_dim, image_size)

    out = generator_forward(x, w1, b1, w2, b2, atype=atype)
    out = jax.block_until_ready(out)

    # Reference check in plain JAX (f32 math; kernel uses bf16 matmul operands,
    # so use a correspondingly loose tolerance).
    h_ref = jnp.maximum(x @ w1 + b1, 0.0)
    y_ref = jax.nn.sigmoid(h_ref @ w2 + b2)
    assert out.shape == (batch, image_size)
    assert jnp.allclose(out, y_ref, atol=2e-2, rtol=2e-2), (
        float(jnp.max(jnp.abs(out - y_ref))))

    # Also exercise the relu head once.
    out_relu = jax.block_until_ready(
        generator_forward(x, w1, b1, w2, b2, atype="relu"))
    y_relu_ref = jnp.maximum(h_ref @ w2 + b2, 0.0)
    assert jnp.allclose(out_relu, y_relu_ref, atol=2e-2, rtol=2e-2)

    print("KERNEL_OK")
</pallas_src>

<mosaic_0001>
module attributes {stable_mosaic.version = 11 : i64} {
  func.func @_generator_kernel(%arg0: i32, %arg1: memref<8x128xbf16, #tpu.memory_space<vmem>>, %arg2: memref<128x128xbf16, #tpu.memory_space<vmem>>, %arg3: memref<1x128xf32, #tpu.memory_space<vmem>>, %arg4: memref<128x128xbf16, #tpu.memory_space<vmem>>, %arg5: memref<1x128xf32, #tpu.memory_space<vmem>>, %arg6: memref<8x128xf32, #tpu.memory_space<vmem>>) attributes {dimension_semantics = [#tpu.dimension_semantics<parallel>], iteration_bounds = array<i64: 1>, scalar_prefetch = 0 : i64, scratch_operands = 0 : i64, tpu.core_type = #tpu.core_type<tc>, window_params = [{transform_indices = @transform_0, window_bounds = array<i64: 8, 128>}, {pipeline_mode = #tpu.pipeline_mode<synchronous>, transform_indices = @transform_1, window_bounds = array<i64: 128, 128>}, {pipeline_mode = #tpu.pipeline_mode<synchronous>, transform_indices = @transform_2, window_bounds = array<i64: 1, 128>}, {pipeline_mode = #tpu.pipeline_mode<synchronous>, transform_indices = @transform_3, window_bounds = array<i64: 128, 128>}, {pipeline_mode = #tpu.pipeline_mode<synchronous>, transform_indices = @transform_4, window_bounds = array<i64: 1, 128>}, {transform_indices = @transform_5, window_bounds = array<i64: 8, 128>}]} {
    %c0 = arith.constant 0 : index
    %c0_0 = arith.constant 0 : index
    %0 = vector.load %arg1[%c0, %c0_0] : memref<8x128xbf16, #tpu.memory_space<vmem>>, vector<8x128xbf16>
    %c0_1 = arith.constant 0 : index
    %c0_2 = arith.constant 0 : index
    %1 = vector.load %arg2[%c0_1, %c0_2] : memref<128x128xbf16, #tpu.memory_space<vmem>>, vector<128x128xbf16>
    %cst = arith.constant dense<0.000000e+00> : vector<8x128xf32>
    %2 = tpu.matmul %0, %1, %cst {dimension_numbers = #tpu.dot_dimension_numbers<[1], [0], [0], [1], [0, 0, 1, 1], [], []>} : vector<8x128xbf16>, vector<128x128xbf16>, vector<8x128xf32> -> vector<8x128xf32>
    %c0_3 = arith.constant 0 : index
    %c0_4 = arith.constant 0 : index
    %3 = vector.load %arg3[%c0_3, %c0_4] : memref<1x128xf32, #tpu.memory_space<vmem>>, vector<1x128xf32>
    %4 = vector.broadcast %3 : vector<1x128xf32> to vector<8x128xf32>
    %5 = arith.addf %2, %4 : vector<8x128xf32>
    %cst_5 = arith.constant 0.000000e+00 : f32
    %6 = vector.broadcast %cst_5 : f32 to vector<8x128xf32>
    %7 = arith.maximumf %5, %6 : vector<8x128xf32>
    %8 = arith.truncf %7 : vector<8x128xf32> to vector<8x128xbf16>
    %c0_6 = arith.constant 0 : index
    %c0_7 = arith.constant 0 : index
    %9 = vector.load %arg4[%c0_6, %c0_7] : memref<128x128xbf16, #tpu.memory_space<vmem>>, vector<128x128xbf16>
    %cst_8 = arith.constant dense<0.000000e+00> : vector<8x128xf32>
    %10 = tpu.matmul %8, %9, %cst_8 {dimension_numbers = #tpu.dot_dimension_numbers<[1], [0], [0], [1], [0, 0, 1, 1], [], []>} : vector<8x128xbf16>, vector<128x128xbf16>, vector<8x128xf32> -> vector<8x128xf32>
    %c0_9 = arith.constant 0 : index
    %c0_10 = arith.constant 0 : index
    %11 = vector.load %arg5[%c0_9, %c0_10] : memref<1x128xf32, #tpu.memory_space<vmem>>, vector<1x128xf32>
    %12 = vector.broadcast %11 : vector<1x128xf32> to vector<8x128xf32>
    %13 = arith.addf %10, %12 : vector<8x128xf32>
    %14 = arith.negf %13 : vector<8x128xf32>
    %15 = math.exp %14 : vector<8x128xf32>
    %cst_11 = arith.constant 1.000000e+00 : f32
    %16 = vector.broadcast %cst_11 : f32 to vector<8x128xf32>
    %17 = arith.addf %16, %15 : vector<8x128xf32>
    %18 = arith.divf %16, %17 : vector<8x128xf32>
    %c0_12 = arith.constant 0 : index
    %c0_13 = arith.constant 0 : index
    %19 = vector.load %arg6[%c0_12, %c0_13] : memref<8x128xf32, #tpu.memory_space<vmem>>, vector<8x128xf32>
    tpu.vector_store %arg6[%c0_12, %c0_13], %18 {strides = array<i32>} : memref<8x128xf32, #tpu.memory_space<vmem>>, vector<8x128xf32>,
    return
  }
  func.func @transform_0(%arg0: i32) -> (i32, i32) {
    %c0_i32 = arith.constant 0 : i32
    %c0_i32_0 = arith.constant 0 : i32
    return %arg0, %c0_i32 : i32, i32
  }
  func.func @transform_1(%arg0: i32) -> (i32, i32) {
    %c0_i32 = arith.constant 0 : i32
    %c0_i32_0 = arith.constant 0 : i32
    %c0_i32_1 = arith.constant 0 : i32
    return %c0_i32, %c0_i32_0 : i32, i32
  }
  func.func @transform_2(%arg0: i32) -> (i32, i32) {
    %c0_i32 = arith.constant 0 : i32
    %c0_i32_0 = arith.constant 0 : i32
    %c0_i32_1 = arith.constant 0 : i32
    return %c0_i32, %c0_i32_0 : i32, i32
  }
  func.func @transform_3(%arg0: i32) -> (i32, i32) {
    %c0_i32 = arith.constant 0 : i32
    %c0_i32_0 = arith.constant 0 : i32
    %c0_i32_1 = arith.constant 0 : i32
    return %c0_i32, %c0_i32_0 : i32, i32
  }
  func.func @transform_4(%arg0: i32) -> (i32, i32) {
    %c0_i32 = arith.constant 0 : i32
    %c0_i32_0 = arith.constant 0 : i32
    %c0_i32_1 = arith.constant 0 : i32
    return %c0_i32, %c0_i32_0 : i32, i32
  }
  func.func @transform_5(%arg0: i32) -> (i32, i32) {
    %c0_i32 = arith.constant 0 : i32
    %c0_i32_0 = arith.constant 0 : i32
    return %arg0, %c0_i32 : i32, i32
  }
}

</mosaic_0001>

<bundles_post_ra>
// kernel: tpu_custom_call.1
= control target key start
LH: loop header
LB: loop body
LE: loop exit
PB: predicated region body
PF: predicated region fallthrough
CT: control target
= control target key end

     0   :  { %10 = vsyncpa [#allocation3], 0  ;;  %s518_s0 = inlined_call_operand.hbm [shape: bf16[8,128], index: 0, kind: input, shape index: {}]   ;;  %s519_s1 = inlined_call_operand.hbm [shape: bf16[128,128], index: 1, kind: input, shape index: {}]   ;;  %s520_s2 = inlined_call_operand.vmem [shape: f32[1,128], index: 2, kind: input, shape index: {}]   ;;  %s521_s3 = inlined_call_operand.hbm [shape: bf16[128,128], index: 3, kind: input, shape index: {}]   ;;  %s522_s4 = inlined_call_operand.vmem [shape: f32[1,128], index: 4, kind: input, shape index: {}]   ;;  %s523_s5 = inlined_call_operand.hbm [shape: f32[8,128], index: 5, kind: output, shape index: {}]  }
   0x1   :  { %11 = vsyncpa [#allocation6], 0  ;;  %s28_s20 = sshll.u32 %s519_s1, 4  ;;  %s29_s20 = int_to_ptr.hbm [resolvable:$true] %s28_s20 }
   0x2   :  { %12 = vsyncpa [#allocation4], 0  ;;  %s464_s21 = smov [#allocation5]   ;;  %s18_s25 = sshll.u32 %s518_s0, 4  ;;  %s19_s25 = int_to_ptr.hbm [resolvable:$true] %s18_s25 }
   0x3   :  { %s30_s22 = sshll.u32 %s464_s21, 4  ;;  %s465_s26 = smov 64   ;;  %s31_s22 = int_to_ptr.vmem [resolvable:$true] %s30_s22 }
   0x4   :  { %s466_s27 = smov 4   ;;  %s467_s28 = smov [#allocation2]  }
   0x5   :  { %36 = dma.hbm_to_vmem [thread:$0]  %s29_s20, 1024, %s31_s22, [#allocation6], %s465_s26, %s465_s26, %s466_s27  }
   0x6   :  { %s20_s29 = sshll.u32 %s467_s28, 4  ;;  %s43_s7 = sshll.u32 %s521_s3, 4  ;;  %s21_s29 = int_to_ptr.vmem [resolvable:$true] %s20_s29  ;;  %s44_s7 = int_to_ptr.hbm [resolvable:$true] %s43_s7 }
   0x7   :  { %23 = dma.hbm_to_vmem [thread:$0]  %s19_s25, 64, %s21_s29, [#allocation3]  }
   0x8   :  { %s468_s1 = smov [#allocation7]  }
   0x9   :  { %s45_s8 = sshll.u32 %s468_s1, 4  ;;  %s46_s8 = int_to_ptr.vmem [resolvable:$true] %s45_s8 }
   0xa   :  { %51 = dma.hbm_to_vmem [thread:$0]  %s44_s7, 1024, %s46_s8, [#allocation6], %s465_s26, %s465_s26, %s466_s27  }
   0xb   :  { %458 = dma.done.wait [#allocation3], 64  }
   0xc   :  { %459 = vsyncadd [#allocation3], 4294967232 }
   0xd   :  { %460 = dma.done.wait [#allocation6], 2048  }
   0xe   :  { %461 = vsyncadd [#allocation6], 4294965248  ;;  %v341_v0 = vld [vmem:[#allocation5 + $0x38] sm:$0xff]  ;;  %v340_v1 = vld [vmem:[#allocation5 + $0x30] sm:$0xff] }
   0xf   :  { %135 = vmatpush.bf16.msra.mxu0 %v341_v0  ;;  %v349_v2 = vld [vmem:[#allocation7 + $0x38] sm:$0xff]  ;;  %v348_v3 = vld [vmem:[#allocation7 + $0x30] sm:$0xff]  ;;  %v339_v4 = vld [vmem:[#allocation5 + $0x28] sm:$0xff] }
  0x10   :  { %218 = vmatpush.bf16.msra.mxu1 %v349_v2  ;;  %v347_v5 = vld [vmem:[#allocation7 + $0x28] sm:$0xff]  ;;  %v338_v6 = vld [vmem:[#allocation5 + $0x20] sm:$0xff]  ;;  %v337_v8 = vld [vmem:[#allocation5 + $0x18] sm:$0xff] }
  0x11   :  { %v346_v7 = vld [vmem:[#allocation7 + $0x20] sm:$0xff]  ;;  %v345_v9 = vld [vmem:[#allocation7 + $0x18] sm:$0xff]  ;;  %v336_v10 = vld [vmem:[#allocation5 + $0x10] sm:$0xff] }
  0x12   :  { %v344_v11 = vld [vmem:[#allocation7 + $0x10] sm:$0xff]  ;;  %v335_v12 = vld [vmem:[#allocation5 + $0x8] sm:$0xff]  ;;  %v334_v13 = vld [vmem:[#allocation5] sm:$0xff] }
  0x13   :  { %136 = vmatpush.bf16.msra.mxu0 %v340_v1  ;;  %v66_v14 = vld [vmem:[#allocation2] sm:$0xf]  ;;  %v343_v15 = vld [vmem:[#allocation7 + $0x8] sm:$0xff]  ;;  %v342_v16 = vld [vmem:[#allocation7] sm:$0xff] }
  0x14   :  { %219 = vmatpush.bf16.msra.mxu1 %v348_v3  ;;  %v356_v17 = vld [vmem:[%s520_s2] ss:$0 sm:$0xff]  ;;  %s469_s2 = smov [#allocation8]  }
  0x15   :  { %v357_v23 = vld [vmem:[%s522_s4] ss:$0 sm:$0xff]  ;;  %s256_s11 = sshll.u32 %s469_s2, 4  ;;  %s258_s4 = sshll.u32 %s523_s5, 4  ;;  %s257_s11 = int_to_ptr.vmem [resolvable:$true] %s256_s11  ;;  %s259_s4 = int_to_ptr.hbm [resolvable:$true] %s258_s4 }
  0x17   :  { %137 = vmatpush.bf16.msra.mxu0 %v339_v4 }
  0x18   :  { %220 = vmatpush.bf16.msra.mxu1 %v347_v5 }
  0x1b   :  { %138 = vmatpush.bf16.msra.mxu0 %v338_v6 }
  0x1c   :  { %221 = vmatpush.bf16.msra.mxu1 %v346_v7 }
  0x1f   :  { %139 = vmatpush.bf16.msra.mxu0 %v337_v8 }
  0x20   :  { %222 = vmatpush.bf16.msra.mxu1 %v345_v9 }
  0x23   :  { %140 = vmatpush.bf16.msra.mxu0 %v336_v10 }
  0x24   :  { %223 = vmatpush.bf16.msra.mxu1 %v344_v11 }
  0x27   :  { %141 = vmatpush.bf16.msra.mxu0 %v335_v12 }
  0x28   :  { %224 = vmatpush.bf16.msra.mxu1 %v343_v15 }
  0x2b   :  { %142 = vmatpush.bf16.msra.mxu0 %v334_v13 }
  0x2c   :  { %225 = vmatpush.bf16.msra.mxu1 %v342_v16 }
  0x2e   :  { %143 = vmatmul.bf16.vlgmr.msra.gmra.mxu0 %v66_v14 }
  0xab   :  { %v144_v18 = vpop.f32.mrf.mxu0 }
  0xac   :  { %v145_v19 = vadd.f32 %v356_v17, %v144_v18 }
  0xae   :  { %v148_v20 = vmax.f32 %v145_v19, 0.0 }
  0xb0   :  { %v149_v21 = vpack.c.bf16 %v148_v20, %v148_v20 }
  0xb2   :  { %226 = vmatmul.bf16.vlgmr.msra.gmra.mxu1 %v149_v21 }
  0xb3   :  { %v146_v22 = vpop.f32.mrf.mxu0 }
 0x12f   :  { %v227_v24 = vpop.f32.mrf.mxu1 }
 0x130   :  { %v228_v25 = vadd.f32 %v357_v23, %v227_v24 }
 0x132   :  { %v333_v26 = vmul.f32 -1.442695, %v228_v25 }
 0x134   :  { %358 = vpow2.f32 %v333_v26 }
 0x137   :  { %v229_v27 = vpop.f32.mrf.mxu1 }
 0x13a   :  { %v359_v28 = vpop.eup %358 }
 0x13b   :  { %v234_v29 = vadd.f32 1.0, %v359_v28 }
 0x13d   :  { %360 = vrcp.f32 %v234_v29  ;;  %v246_v33 = vand.u32 2147483648, %v234_v29  ;;  %v244_v35 = vand.u32 2147483647, %v234_v29  ;;  %vm240_vm1 = vweird.f32 %v234_v29 }
 0x13f   :  { %v247_v37 = vor.u32 1.1754944e-38, %v246_v33  ;;  %vm245_vm3 = vcmp.eq.f32.partialorder %v244_v35, 8.507059e+37 }
 0x143   :  { %v361_v30 = vpop.eup %360 }
 0x144   :  { %v236_v31 = vmul.f32 %v361_v30, %v234_v29  ;;  %vm241_vm0 = vweird.f32 %v361_v30 }
 0x145   :  { %vm242_vm2 = vmor %vm240_vm1, %vm241_vm0 }
 0x146   :  { %v237_v32 = vsub.f32 1.0, %v236_v31 }
 0x148   :  { %v238_v34 = vmul.f32 %v361_v30, %v237_v32 }
 0x14a   :  { %v239_v36 = vadd.f32 %v361_v30, %v238_v34 }
 0x14c   :  { %v243_v38 = vsel %vm242_vm2, %v361_v30, %v239_v36 }
 0x14d   :  { %v248_v39 = vsel %vm245_vm3, %v247_v37, %v243_v38 }
 0x14e   :  { %250 = vst [vmem:[#allocation8] sm:$0xff] %v248_v39 }
 0x14f   :  { %261 = dma.vmem_to_hbm [thread:$0]  %s257_s11, 128, %s259_s4, [#allocation4]  }
 0x150   :  { %462 = dma.done.wait [#allocation4], 128  }
 0x151   :  { %463 = vsyncadd [#allocation4], 4294967168 }
 0x152   :  { %266 = vsyncpa [#allocation3], 1 }
 0x153   :  { %267 = vsyncpa [#allocation6], 1 }
 0x154   :  { %268 = vsyncpa [#allocation4], 1 }

</bundles_post_ra>
